<compile_context>
chip_gen: v7x
topology: tpu7x:2x2x1
jax: 0.10.0
libtpu: 0.0.40
codegen_flags: <defaults>
</compile_context>

<pallas_src>
import dataclasses
import functools
import math

import jax
import jax.numpy as jnp
from jax import lax
from jax.experimental import pallas as pl
from jax.experimental.pallas import tpu as pltpu


@dataclasses.dataclass(frozen=True)
class GLMConfig:
    hidden_size: int = 32
    num_attention_heads: int = 4
    kv_channels: int = 8
    multi_query_attention: bool = True
    multi_query_group_num: int = 2
    add_bias_linear: bool = False
    add_qkv_bias: bool = True


# ---------------------------------------------------------------------------
# Tile picking: prefer multiples of 128 (lane-dense), then multiples of 8, else full dim.
# ---------------------------------------------------------------------------
def _pick_tile(dim, cap):
    if dim <= cap:
        return dim
    for step in (128, 8):
        t = (cap // step) * step
        while t >= step:
            if dim % t == 0:
                return t
            t -= step
    return dim  # single block on this axis


# ---------------------------------------------------------------------------
# Pallas kernel 1: tiled matmul + bias (query_key_value and dense projections)
# ---------------------------------------------------------------------------
def _linear_kernel(*refs, n_k, has_bias):
    if has_bias:
        x_ref, w_ref, b_ref, o_ref = refs[:4]
        rest = refs[4:]
    else:
        x_ref, w_ref, o_ref = refs[:3]
        b_ref = None
        rest = refs[3:]

    if n_k == 1:
        # Fast path: no K split -> no accumulator scratch, no init/finalize epilogue.
        acc = jnp.dot(x_ref[...], w_ref[...], preferred_element_type=jnp.float32)
        if b_ref is not None:
            acc = acc + b_ref[...].astype(jnp.float32)
        o_ref[...] = acc.astype(o_ref.dtype)
        return

    acc_ref = rest[0]

    @pl.when(pl.program_id(2) == 0)
    def _():
        acc_ref[...] = jnp.zeros_like(acc_ref)

    acc_ref[...] += jnp.dot(x_ref[...], w_ref[...], preferred_element_type=jnp.float32)

    @pl.when(pl.program_id(2) == n_k - 1)
    def _():
        acc = acc_ref[...]
        if b_ref is not None:
            acc = acc + b_ref[...].astype(jnp.float32)
        o_ref[...] = acc.astype(o_ref.dtype)


def pallas_linear(x, w, b=None):
    """y = x @ w (+ b).  x:(M,K), w:(K,N), b:(N,) or None."""
    M, K = x.shape
    K2, N = w.shape
    assert K == K2
    tm = _pick_tile(M, 256)
    tn = _pick_tile(N, 512)
    tk = _pick_tile(K, 512)
    grid = (M // tm, N // tn, K // tk)
    n_k = grid[2]
    has_bias = b is not None

    in_specs = [
        pl.BlockSpec((tm, tk), lambda i, j, k: (i, k)),
        pl.BlockSpec((tk, tn), lambda i, j, k: (k, j)),
    ]
    args = [x, w]
    if has_bias:
        in_specs.append(pl.BlockSpec((1, tn), lambda i, j, k: (0, j)))
        args.append(b.reshape(1, N))

    scratch = [] if n_k == 1 else [pltpu.VMEM((tm, tn), jnp.float32)]
    kernel = functools.partial(_linear_kernel, n_k=n_k, has_bias=has_bias)

    return pl.pallas_call(
        kernel,
        out_shape=jax.ShapeDtypeStruct((M, N), x.dtype),
        grid_spec=pltpu.PrefetchScalarGridSpec(
            num_scalar_prefetch=0,
            grid=grid,
            in_specs=in_specs,
            out_specs=pl.BlockSpec((tm, tn), lambda i, j, k: (i, j)),
            scratch_shapes=scratch,
        ),
        compiler_params=pltpu.CompilerParams(
            dimension_semantics=("parallel", "parallel", "arbitrary"),
            vmem_limit_bytes=32 * 1024 * 1024),
    )(*args)


# ---------------------------------------------------------------------------
# Pallas kernel 2: flash-style fused core attention (per (batch, kv-group, q-tile)).
# ---------------------------------------------------------------------------
def _flash_attn_kernel(*refs, scale, hpg, tq, tk, mask_mode, seq_major):
    if mask_mode == "bias":
        q_ref, k_ref, v_ref, bias_ref, o_ref, m_ref, l_ref, acc_ref = refs
    else:
        q_ref, k_ref, v_ref, o_ref, m_ref, l_ref, acc_ref = refs
        bias_ref = None

    qi = pl.program_id(2)
    ki = pl.program_id(3)
    M = tq * hpg
    D = q_ref.shape[-1]

    @pl.when(ki == 0)
    def _():
        m_ref[...] = jnp.full_like(m_ref, -1e30)
        l_ref[...] = jnp.zeros_like(l_ref)
        acc_ref[...] = jnp.zeros_like(acc_ref)

    # Q block is (1, tq, hpg, D) (seq-major) or (1, hpg, tq, D) (head-major).  Collapsing
    # the two leading dims is a pure re-tiling: the dim folded into sublanes (hpg resp. tq)
    # is a multiple of 8 on the path that uses it.  Scale is folded into the bf16 Q operand.
    q = q_ref[0].reshape(M, D) * scale                    # bf16 MXU operand
    k = k_ref[0, 0]                                       # (tk, D) bf16
    v = v_ref[0, 0]                                       # (tk, D) bf16

    s = lax.dot_general(q, k, (((1,), (1,)), ((), ())),
                        preferred_element_type=jnp.float32)   # (M, tk) f32

    if mask_mode == "causal":
        row = lax.broadcasted_iota(jnp.int32, (M, tk), 0)
        col = lax.broadcasted_iota(jnp.int32, (M, tk), 1)
        q_pos = qi * tq + (row // hpg if seq_major else row % tq)
        k_pos = ki * tk + col
        s = jnp.where(k_pos > q_pos, jnp.float32(-1e30), s)
    elif mask_mode == "bias":
        b2 = bias_ref[0]                                  # (tq, tk) f32
        if seq_major:
            b2 = jnp.broadcast_to(b2[:, None, :], (tq, hpg, tk)).reshape(M, tk)
        else:
            b2 = jnp.broadcast_to(b2[None, :, :], (hpg, tq, tk)).reshape(M, tk)
        s = s + b2

    m_prev = m_ref[...]
    m_new = jnp.maximum(m_prev, jnp.max(s, axis=-1, keepdims=True))
    alpha = jnp.exp(m_prev - m_new)
    p = jnp.exp(s - m_new)
    l_ref[...] = alpha * l_ref[...] + jnp.sum(p, axis=-1, keepdims=True)
    acc_ref[...] = alpha * acc_ref[...] + lax.dot_general(
        p.astype(v.dtype), v, (((1,), (0,)), ((), ())),
        preferred_element_type=jnp.float32)
    m_ref[...] = m_new

    @pl.when(ki == pl.num_programs(3) - 1)
    def _():
        inv = pl.reciprocal(l_ref[...], approx=True)      # EUP slot, not a VALU divide
        ctx = acc_ref[...] * inv                          # (M, D) f32
        if seq_major:
            o_ref[0] = ctx.reshape(tq, hpg, D).astype(o_ref.dtype)
        else:
            o_ref[0] = ctx.reshape(hpg, tq, D).astype(o_ref.dtype)


def pallas_attention(q, k, v, scale, attention_mask=None, causal=False):
    """q: (B, S, H, D); k, v: (B, G, Sk, D).  Returns context as (B, S, H, D) in v.dtype."""
    B, S, H, D = q.shape
    _, G, Sk, _ = k.shape
    assert H % G == 0
    hpg = H // G

    tq = _pick_tile(S, 128)
    tk = _pick_tile(Sk, 512)
    n_q, n_kt = S // tq, Sk // tk
    M = tq * hpg

    # Real GLM shapes (hpg % 8 == 0) read Q in its natural (B, S, H, D) layout: no HBM
    # transpose of Q, and the output is emitted directly in (B, S, H, D) for the dense.
    seq_major = (hpg % 8 == 0)

    if seq_major:
        q_in = q
        q_spec = pl.BlockSpec((1, tq, hpg, D), lambda b, g, i, j: (b, i, g, 0))
        o_shape = (B, S, H, D)
        o_spec = pl.BlockSpec((1, tq, hpg, D), lambda b, g, i, j: (b, i, g, 0))
    else:
        # TODO(synk): small / non-8-aligned head groups (e.g. the toy config) fall back to a
        # head-major layout, paying one transpose of Q and of the context in XLA.
        q_in = q.transpose(0, 2, 1, 3)                    # (B, H, S, D)
        q_spec = pl.BlockSpec((1, hpg, tq, D), lambda b, g, i, j: (b, g, i, 0))
        o_shape = (B, H, S, D)
        o_spec = pl.BlockSpec((1, hpg, tq, D), lambda b, g, i, j: (b, g, i, 0))

    kv_spec = pl.BlockSpec((1, 1, tk, D), lambda b, g, i, j: (b, g, j, 0))

    in_specs = [q_spec, kv_spec, kv_spec]
    args = [q_in, k, v]

    if attention_mask is not None:
        mask_mode = "bias"
        bias = jnp.where(attention_mask.reshape(-1, S, Sk),
                         jnp.float32(-1e30), jnp.float32(0.0))
        if bias.shape[0] == B:
            bias_spec = pl.BlockSpec((1, tq, tk), lambda b, g, i, j: (b, i, j))
        else:
            bias_spec = pl.BlockSpec((1, tq, tk), lambda b, g, i, j: (0, i, j))
        in_specs.append(bias_spec)
        args.append(bias)
    else:
        mask_mode = "causal" if causal else "none"

    kernel = functools.partial(_flash_attn_kernel, scale=scale, hpg=hpg, tq=tq, tk=tk,
                               mask_mode=mask_mode, seq_major=seq_major)

    out = pl.pallas_call(
        kernel,
        out_shape=jax.ShapeDtypeStruct(o_shape, v.dtype),
        grid_spec=pltpu.PrefetchScalarGridSpec(
            num_scalar_prefetch=0,
            grid=(B, G, n_q, n_kt),
            in_specs=in_specs,
            out_specs=o_spec,
            scratch_shapes=[
                pltpu.VMEM((M, 1), jnp.float32),   # running max
                pltpu.VMEM((M, 1), jnp.float32),   # running denom
                pltpu.VMEM((M, D), jnp.float32),   # running context accumulator
            ],
        ),
        compiler_params=pltpu.CompilerParams(
            dimension_semantics=("parallel", "parallel", "parallel", "arbitrary"),
            vmem_limit_bytes=32 * 1024 * 1024),
    )(*args)

    if seq_major:
        return out                                        # (B, S, H, D)
    return out.transpose(0, 2, 1, 3)                      # -> (B, S, H, D)


# ---------------------------------------------------------------------------
# XLA glue: rotary embedding in the natural (B, S, heads, D) layout (same math as torch).
# TODO(synk): pair-interleaved lane layout has no clean Pallas win; kept as XLA glue.
# ---------------------------------------------------------------------------
def apply_rotary_pos_emb(x, rope_cache):
    b, sq, nh, _ = x.shape
    rot_dim = rope_cache.shape[-2] * 2
    x_rot, x_pass = x[..., :rot_dim], x[..., rot_dim:]
    rc = rope_cache[:, :sq].reshape(-1, sq, 1, rot_dim // 2, 2)
    xs = x_rot.reshape(b, sq, nh, rot_dim // 2, 2)
    xe, xo = xs[..., 0], xs[..., 1]
    c, s = rc[..., 0], rc[..., 1]
    out = jnp.stack([xe * c - xo * s, xo * c + xe * s], axis=-1).reshape(b, sq, nh, rot_dim)
    res = jnp.concatenate([out, x_pass.astype(out.dtype)], axis=-1)
    return res.astype(x.dtype)


# ---------------------------------------------------------------------------
# Pure-JAX references (same dtype flow) for correctness checking
# ---------------------------------------------------------------------------
def _linear_reference(x, w, b=None):
    y = jnp.dot(x, w, preferred_element_type=jnp.float32)
    if b is not None:
        y = y + b.astype(jnp.float32)
    return y.astype(x.dtype)


def _attention_reference(q, k, v, scale, attention_mask=None, causal=False):
    B, S, H, D = q.shape
    _, G, Sk, _ = k.shape
    hpg = H // G
    qf = q.astype(jnp.float32).transpose(0, 2, 1, 3)           # (B, H, S, D)
    kf = jnp.repeat(k, hpg, axis=1).astype(jnp.float32)        # (B, H, Sk, D)
    vf = jnp.repeat(v, hpg, axis=1)                            # (B, H, Sk, D)
    s = jnp.einsum('bhqd,bhkd->bhqk', qf, kf) * scale
    if attention_mask is not None:
        s = jnp.where(attention_mask.reshape(-1, 1, S, Sk), -jnp.inf, s)
    elif causal:
        tri = jnp.triu(jnp.ones((S, Sk), bool), 1)
        s = jnp.where(tri[None, None], -jnp.inf, s)
    p = jax.nn.softmax(s, axis=-1).astype(v.dtype)
    ctx = jnp.einsum('bhqk,bhkd->bhqd', p, vf, preferred_element_type=jnp.float32)
    return ctx.transpose(0, 2, 1, 3).astype(v.dtype)           # (B, S, H, D)


# ---------------------------------------------------------------------------
# Full AttentionBlock forward
# ---------------------------------------------------------------------------
def attention_block_forward(config, params, hidden_states, attention_mask,
                            rotary_pos_emb, kv_cache=None, use_cache=True,
                            use_pallas=True):
    B, S, hidden = hidden_states.shape
    H, D = config.num_attention_heads, config.kv_channels
    proj = H * D
    G = config.multi_query_group_num if config.multi_query_attention else H
    scale = 1.0 / math.sqrt(D)
    linear = pallas_linear if use_pallas else _linear_reference
    attn = pallas_attention if use_pallas else _attention_reference

    # query_key_value projection
    qkv = linear(hidden_states.reshape(B * S, hidden), params["wqkv"], params.get("bqkv"))
    qkv = qkv.reshape(B, S, -1)

    if config.multi_query_attention:
        q_sz, kv_sz = H * D, G * D
        q = qkv[..., :q_sz].reshape(B, S, H, D)
        k = qkv[..., q_sz:q_sz + kv_sz].reshape(B, S, G, D)
        v = qkv[..., q_sz + kv_sz:].reshape(B, S, G, D)
    else:
        qkv3 = qkv.reshape(B, S, H, 3 * D)
        q, k, v = qkv3[..., :D], qkv3[..., D:2 * D], qkv3[..., 2 * D:]

    # RoPE in the natural (B, S, heads, D) layout: Q takes no layout round trip via HBM.
    if rotary_pos_emb is not None:
        q = apply_rotary_pos_emb(q, rotary_pos_emb)
        k = apply_rotary_pos_emb(k, rotary_pos_emb)

    # K/V to (B, G, Sk, D): required anyway by the torch kv-cache layout.
    k = k.transpose(0, 2, 1, 3)
    v = v.transpose(0, 2, 1, 3)

    if kv_cache is not None:
        # TODO(synk): for decode, replace the concat with an in-place cache update
        # (lax.dynamic_update_slice / input_output_aliases) to avoid copying the cache.
        k = jnp.concatenate([kv_cache[0], k.astype(kv_cache[0].dtype)], axis=2)
        v = jnp.concatenate([kv_cache[1], v.astype(kv_cache[1].dtype)], axis=2)
    if use_cache:
        if kv_cache is None:
            new_kv_cache = jnp.concatenate(
                [k[None, None], v[None, None].astype(k.dtype)], axis=1)
        else:
            new_kv_cache = (k, v)
    else:
        new_kv_cache = None

    Sk = k.shape[2]
    causal = attention_mask is None and S == Sk

    context = attn(q, k, v, scale, attention_mask=attention_mask, causal=causal)
    context = context.reshape(B * S, proj)                # free: contiguous (B,S,H,D)

    out = linear(context, params["wdense"], params.get("bdense"))
    return out.reshape(B, S, hidden), new_kv_cache


if __name__ == "__main__":
    config = GLMConfig()
    B, S = 2, 8
    H, D, G = config.num_attention_heads, config.kv_channels, config.multi_query_group_num
    hidden = config.hidden_size
    proj = H * D
    qkv_hidden = proj + 2 * G * D if config.multi_query_attention else 3 * proj

    key = jax.random.PRNGKey(0)
    k1, k2, k3, k4 = jax.random.split(key, 4)
    params = {
        "wqkv": (0.05 * jax.random.normal(k1, (hidden, qkv_hidden), jnp.float32)).astype(jnp.bfloat16),
        "bqkv": (0.02 * jax.random.normal(k2, (qkv_hidden,), jnp.float32)).astype(jnp.bfloat16),
        "wdense": (0.05 * jax.random.normal(k3, (proj, hidden), jnp.float32)).astype(jnp.bfloat16),
        "bdense": None,
    }
    hidden_states = jax.random.normal(k4, (B, S, hidden), jnp.float32).astype(jnp.bfloat16)

    # RoPE cache (GLM4: rotary n_elem = head_dim // 2), shape (1, S, n_elem//2, 2) f32.
    n_elem = D // 2
    theta = 1.0 / (10000.0 ** (jnp.arange(0, n_elem, 2, dtype=jnp.float32) / n_elem))
    idx_theta = jnp.outer(jnp.arange(S, dtype=jnp.float32), theta)
    rope_cache = jnp.stack([jnp.cos(idx_theta), jnp.sin(idx_theta)], axis=-1)[None]

    out, new_kv_cache = attention_block_forward(
        config, params, hidden_states, None, rope_cache,
        kv_cache=None, use_cache=True, use_pallas=True)
    out = jax.block_until_ready(out)
    new_kv_cache = jax.block_until_ready(new_kv_cache)

    ref_out, _ = attention_block_forward(
        config, params, hidden_states, None, rope_cache,
        kv_cache=None, use_cache=True, use_pallas=False)

    assert out.shape == (B, S, hidden) and out.dtype == jnp.bfloat16, out.shape
    assert new_kv_cache.shape == (1, 2, B, G, S, D), new_kv_cache.shape
    diff = jnp.max(jnp.abs(out.astype(jnp.float32) - ref_out.astype(jnp.float32)))
    assert jnp.allclose(out.astype(jnp.float32), ref_out.astype(jnp.float32),
                        atol=2e-2, rtol=2e-2), float(diff)
    print("KERNEL_OK")
</pallas_src>

<mosaic_0001>
module attributes {stable_mosaic.version = 11 : i64} {
  func.func @_linear_kernel(%arg0: i32, %arg1: i32, %arg2: i32, %arg3: memref<16x32xbf16, #tpu.memory_space<vmem>>, %arg4: memref<32x64xbf16, #tpu.memory_space<vmem>>, %arg5: memref<1x64xbf16, #tpu.memory_space<vmem>>, %arg6: memref<16x64xbf16, #tpu.memory_space<vmem>>) attributes {dimension_semantics = [#tpu.dimension_semantics<parallel>, #tpu.dimension_semantics<parallel>, #tpu.dimension_semantics<arbitrary>], iteration_bounds = array<i64: 1, 1, 1>, scalar_prefetch = 0 : i64, scratch_operands = 0 : i64, tpu.core_type = #tpu.core_type<tc>, window_params = [{transform_indices = @transform_0, window_bounds = array<i64: 16, 32>}, {transform_indices = @transform_1, window_bounds = array<i64: 32, 64>}, {transform_indices = @transform_2, window_bounds = array<i64: 1, 64>}, {transform_indices = @transform_3, window_bounds = array<i64: 16, 64>}]} {
    %c0 = arith.constant 0 : index
    %c0_0 = arith.constant 0 : index
    %0 = vector.load %arg3[%c0, %c0_0] : memref<16x32xbf16, #tpu.memory_space<vmem>>, vector<16x32xbf16>
    %c0_1 = arith.constant 0 : index
    %c0_2 = arith.constant 0 : index
    %1 = vector.load %arg4[%c0_1, %c0_2] : memref<32x64xbf16, #tpu.memory_space<vmem>>, vector<32x64xbf16>
    %cst = arith.constant dense<0.000000e+00> : vector<16x64xf32>
    %2 = tpu.matmul %0, %1, %cst {dimension_numbers = #tpu.dot_dimension_numbers<[1], [0], [0], [1], [0, 0, 1, 1], [], []>} : vector<16x32xbf16>, vector<32x64xbf16>, vector<16x64xf32> -> vector<16x64xf32>
    %c0_3 = arith.constant 0 : index
    %c0_4 = arith.constant 0 : index
    %3 = vector.load %arg5[%c0_3, %c0_4] : memref<1x64xbf16, #tpu.memory_space<vmem>>, vector<1x64xbf16>
    %4 = arith.extf %3 : vector<1x64xbf16> to vector<1x64xf32>
    %5 = vector.broadcast %4 : vector<1x64xf32> to vector<16x64xf32>
    %6 = arith.addf %2, %5 : vector<16x64xf32>
    %7 = arith.truncf %6 : vector<16x64xf32> to vector<16x64xbf16>
    %c0_5 = arith.constant 0 : index
    %c0_6 = arith.constant 0 : index
    %8 = vector.load %arg6[%c0_5, %c0_6] : memref<16x64xbf16, #tpu.memory_space<vmem>>, vector<16x64xbf16>
    tpu.vector_store %arg6[%c0_5, %c0_6], %7 {strides = array<i32>} : memref<16x64xbf16, #tpu.memory_space<vmem>>, vector<16x64xbf16>,
    return
  }
  func.func @transform_0(%arg0: i32, %arg1: i32, %arg2: i32) -> (i32, i32) {
    %c0_i32 = arith.constant 0 : i32
    return %arg0, %arg2 : i32, i32
  }
  func.func @transform_1(%arg0: i32, %arg1: i32, %arg2: i32) -> (i32, i32) {
    %c0_i32 = arith.constant 0 : i32
    return %arg2, %arg1 : i32, i32
  }
  func.func @transform_2(%arg0: i32, %arg1: i32, %arg2: i32) -> (i32, i32) {
    %c0_i32 = arith.constant 0 : i32
    %c0_i32_0 = arith.constant 0 : i32
    return %c0_i32, %arg1 : i32, i32
  }
  func.func @transform_3(%arg0: i32, %arg1: i32, %arg2: i32) -> (i32, i32) {
    %c0_i32 = arith.constant 0 : i32
    return %arg0, %arg1 : i32, i32
  }
}

</mosaic_0001>

<bundles_post_ra>
// kernel: tpu_custom_call.1
= control target key start
LH: loop header
LB: loop body
LE: loop exit
PB: predicated region body
PF: predicated region fallthrough
CT: control target
= control target key end

     0   :  { %8 = vsyncpa [#allocation3], 0  ;;  %s323_s0 = inlined_call_operand.hbm [shape: bf16[16,32], index: 0, kind: input, shape index: {}]   ;;  %s324_s1 = inlined_call_operand.hbm [shape: bf16[32,64], index: 1, kind: input, shape index: {}]   ;;  %s325_s2 = inlined_call_operand.vmem [shape: bf16[1,64], index: 2, kind: input, shape index: {}]   ;;  %s326_s3 = inlined_call_operand.hbm [shape: bf16[16,64], index: 3, kind: output, shape index: {}]  }
   0x1   :  { %9 = vsyncpa [#allocation6], 0 }
   0x2   :  { %10 = vsyncpa [#allocation4], 0  ;;  %s248_s12 = smov [#allocation2]   ;;  %s176_s16 = scalar_lea.hbm %s323_s0, 128 }
   0x3   :  { %s16_s13 = sshll.u32 %s248_s12, 4  ;;  %p177_p0 = scmp.ne.s32.totalorder %s323_s0, %s176_s16  ;;  %s17_s13 = int_to_ptr.vmem [resolvable:$true] %s16_s13 }
   0x4   :  { %p180_p1 = scmp.lt.u32.totalorder %s176_s16, %s323_s0 }
   0x6   :  { %p182_p2 = pnand %p180_p1, %p177_p0 }
   0x8   :  { %185 = shalt.err (!%p182_p2)
}
   0x9   :  { %s186_s21 = scalar_lea.vmem %s17_s13, 128  ;;  %p191_p4 = scmp.lt.s32.totalorder %s17_s13, %s17_s13 }
   0xa   :  { %p187_p3 = scmp.ne.s32.totalorder %s17_s13, %s186_s21  ;;  %p192_p5 = scmp.lt.s32.totalorder %s186_s21, %s186_s21 }
   0xc   :  { %p193_p6 = por %p192_p5, %p191_p4 }
   0xe   :  { %p194_p7 = pnand %p193_p6, %p187_p3 }
  0x10   :  { %197 = shalt.err (!%p194_p7)
}
  0x11   :  { %s249_s22 = smov 64   ;;  %s250_s23 = smov 4  }
  0x12   :  { %22 = dma.hbm_to_vmem [thread:$0]  %s323_s0, 128, %s17_s13, [#allocation3], %s249_s22, %s249_s22, %s250_s23  }
  0x13   :  { %s251_s26 = smov [#allocation5]   ;;  %s198_s30 = scalar_lea.hbm %s324_s1, 256 }
  0x14   :  { %s28_s27 = sshll.u32 %s251_s26, 4  ;;  %p199_p8 = scmp.ne.s32.totalorder %s324_s1, %s198_s30  ;;  %s29_s27 = int_to_ptr.vmem [resolvable:$true] %s28_s27 }
  0x15   :  { %p202_p9 = scmp.lt.u32.totalorder %s198_s30, %s324_s1 }
  0x17   :  { %p204_p10 = pnand %p202_p9, %p199_p8 }
  0x19   :  { %207 = shalt.err (!%p204_p10)
}
  0x1a   :  { %s208_s8 = scalar_lea.vmem %s29_s27, 256  ;;  %p213_p12 = scmp.lt.s32.totalorder %s29_s27, %s29_s27 }
  0x1b   :  { %p209_p11 = scmp.ne.s32.totalorder %s29_s27, %s208_s8  ;;  %p214_p13 = scmp.lt.s32.totalorder %s208_s8, %s208_s8 }
  0x1d   :  { %p215_p0 = por %p214_p13, %p213_p12 }
  0x1f   :  { %p216_p1 = pnand %p215_p0, %p209_p11 }
  0x21   :  { %219 = shalt.err (!%p216_p1)
}
  0x22   :  { %34 = dma.hbm_to_vmem [thread:$0]  %s324_s1, 256, %s29_s27, [#allocation6], %s249_s22, %s249_s22, %s250_s23  }
  0x23   :  { %242 = dma.done.wait [#allocation3], 128  }
  0x24   :  { %243 = vsyncadd [#allocation3], 4294967168 }
  0x25   :  { %244 = dma.done.wait [#allocation6], 256  }
  0x26   :  { %245 = vsyncadd [#allocation6], 4294967040  ;;  %v252_v0 = vmov 0.0   ;;  %vm253_vm0 = vmmov 0   ;;  %v173_v1 = vld [vmem:[#allocation5] sm:$0xff]   ;;  %v174_v2 = vld [vmem:[#allocation5 + $0x8] sm:$0xff]   ;;  %v52_v4 = vlaneseq }
  0x27   :  { %158 = vmatprep.subr.bf16.mxu0 %v252_v0  ;;  %162 = vmatprep.mubr.msk.bf16.mxu0 %vm253_vm0, %v252_v0  ;;  %v175_v3 = vld [vmem:[#allocation2] sm:$0xff]   ;;  %vm73_vm1 = vcmask 261120   ;;  %vm126_vm2 = vcmask 519168   ;;  %s254_s11 = smov [#allocation7]  }
  0x28   :  { %159 = vmatpush3.bf16.msra.mxu0 %v173_v1  ;;  %v53_v5 = vshrl.u32 %v52_v4, 7  ;;  %v50_v6 = vld [vmem:[%s325_s2] sm:$0x1]  ;;  %s134_s12 = sshll.u32 %s254_s11, 4  ;;  %s135_s12 = int_to_ptr.vmem [resolvable:$true] %s134_s12 }
  0x29   :  { %160 = vmatprep.subr.bf16.mxu0 %v252_v0  ;;  %v51_v7 = vunpack.c.l.bf16 %v50_v6  ;;  %s220_s13 = scalar_lea.vmem %s135_s12, 128  ;;  %p225_p3 = scmp.lt.s32.totalorder %s135_s12, %s135_s12 }
  0x2a   :  { %v54_v8 = vsub.s32 0, %v53_v5  ;;  %p221_p2 = scmp.ne.s32.totalorder %s135_s12, %s220_s13  ;;  %p226_p4 = scmp.lt.s32.totalorder %s220_s13, %s220_s13 }
  0x2c   :  { %161 = vmatpush3.bf16.msra.mxu0 %v174_v2  ;;  %v55_v9 = vrot.slane %v51_v7, %v54_v8  ;;  %p227_p5 = por %p226_p4, %p225_p3 }
  0x2e   :  { %p228_p6 = pnand %p227_p5, %p221_p2 }
  0x2f   :  { %163 = vmatmul.mubr.msk.bf16.vlgmr.msra.gmra.mrb[0].mxu0 %vm73_vm1, %v175_v3 }
 0x102   :  { %v111_v10 = vpop.f32.mrb[0].mxu0 }
 0x103   :  { %v112_v11 = vadd.f32 %v111_v10, %v55_v9  ;;  %v164_v12 = vpop.f32.mrb[1].mxu0 }
 0x104   :  { %v114_v13 = vpop.f32.mrb[2].mxu0 }
 0x105   :  { %v153_v14 = vpack.c.bf16 %v112_v11, %v112_v11  ;;  %v115_v15 = vadd.f32 %v114_v13, %v55_v9  ;;  %v165_v16 = vpop.f32.mrb[3].mxu0 }
 0x107   :  { %v154_v17 = vpack.c.bf16 %v115_v15, %v115_v15  ;;  %127 = vst.msk [vmem:[#allocation7] sm:$0xf] %vm126_vm2, %v153_v14 }
 0x109   :  { %128 = vst.msk [vmem:[#allocation7 + $0x4] sm:$0xf] %vm126_vm2, %v154_v17 }
 0x10a   :  { %231 = shalt.err (!%p228_p6)
}
 0x10b   :  { %s232_s15 = scalar_lea.hbm %s326_s3, 128 }
 0x10c   :  { %p233_p7 = scmp.ne.s32.totalorder %s326_s3, %s232_s15  ;;  %p236_p8 = scmp.lt.u32.totalorder %s232_s15, %s326_s3 }
 0x10e   :  { %p238_p9 = pnand %p236_p8, %p233_p7 }
 0x110   :  { %241 = shalt.err (!%p238_p9)
}
 0x111   :  { %140 = dma.vmem_to_hbm [thread:$0]  %s135_s12, 128, %s326_s3, [#allocation4], %s249_s22, %s249_s22, %s250_s23  }
 0x112   :  { %246 = dma.done.wait [#allocation4], 128  }
 0x113   :  { %247 = vsyncadd [#allocation4], 4294967168 }
 0x114   :  { %144 = vsyncpa [#allocation3], 1 }
 0x115   :  { %145 = vsyncpa [#allocation6], 1 }
 0x116   :  { %146 = vsyncpa [#allocation4], 1 }

</bundles_post_ra>
